<compile_context>
chip_gen: v7x
topology: tpu7x:2x2x1
jax: 0.10.0
libtpu: 0.0.40
codegen_flags: <defaults>
</compile_context>

<pallas_src>
import jax
import jax.numpy as jnp
from jax import lax
from jax.experimental import pallas as pl
from jax.experimental.pallas import tpu as pltpu


def _round_up(n, m):
    return (n + m - 1) // m * m


def _cdiv(a, b):
    return -(-a // b)


def _make_rnn_kernel(tt, reverse, masked):
    """Recurrence kernel for one (batch-tile, time-block) grid step.

    Per timestep:  pre   = h_old @ U + xw_t        (xw_t = x_t @ W + b, hoisted)
                   h_new = tanh(pre)                (f32)
      masked:      h_t = h_new*m + h_old*(1-m);  y_t = h_new*m + y_prev*(1-m)
      no mask:     h_t = y_t = h_new
    h (and y_prev) are carried through the unrolled inner loop as values
    (vreg-resident) and persisted in VMEM scratch across grid steps.
    """
    if masked:
        def kernel(xw_ref, m_ref, u_ref, h0_ref, y_ref, h_scr, yp_scr):
            ti = pl.program_id(1)

            @pl.when(ti == 0)
            def _init():
                h_scr[...] = h0_ref[...]
                yp_scr[...] = jnp.zeros_like(yp_scr)

            n_tb = pl.num_programs(1)
            blk = (n_tb - 1 - ti) if reverse else ti
            t0 = blk * tt
            u = u_ref[...]                     # resident weights, read once per block

            def step(s, carry):
                h_old, y_prev = carry
                i = (tt - 1 - s) if reverse else s
                xw_t = xw_ref[i].astype(jnp.float32)         # (BT, Dhp)
                m_t = m_ref[t0 + i]                          # (BT, 1) resident mask
                pre = jnp.dot(h_old.astype(u.dtype), u,
                              preferred_element_type=jnp.float32) + xw_t
                h_new = jnp.tanh(pre)
                keep = 1.0 - m_t
                h_t = h_new * m_t + h_old * keep
                y_t = h_new * m_t + y_prev * keep
                y_ref[i] = y_t.astype(y_ref.dtype)
                return h_t, y_t

            h, yp = lax.fori_loop(0, tt, step, (h_scr[...], yp_scr[...]),
                                  unroll=True)
            h_scr[...] = h
            yp_scr[...] = yp

        return kernel

    def kernel(xw_ref, u_ref, h0_ref, y_ref, h_scr):
        ti = pl.program_id(1)

        @pl.when(ti == 0)
        def _init():
            h_scr[...] = h0_ref[...]

        u = u_ref[...]

        def step(s, h_old):
            i = (tt - 1 - s) if reverse else s
            pre = jnp.dot(h_old.astype(u.dtype), u,
                          preferred_element_type=jnp.float32) \
                + xw_ref[i].astype(jnp.float32)
            h_new = jnp.tanh(pre)
            y_ref[i] = h_new.astype(y_ref.dtype)
            return h_new

        h = lax.fori_loop(0, tt, step, h_scr[...], unroll=True)
        h_scr[...] = h

    return kernel


def rnn_layer_forward(x, W, U, b, mask=None, h0=None, reverse=False,
                      compute_dtype=jnp.bfloat16, time_block=8):
    """RNNLayer.forward (default: return all outputs).

    x:    (B, T, D_in) float
    W:    (D_in, D_hid), U: (D_hid, D_hid), b: (D_hid,)
    mask: (B, T) optional float/bool mask
    h0:   (B, D_hid) optional initial state (cell.set_init_states)
    Returns y: (B, T, D_hid)  ==  torch.stack(y_list, 1)

    compute_dtype: dtype feeding the MXU (bf16 by default; pass jnp.float32
    for exact f32-module numerics). Accumulation / tanh / blend are f32.
    """
    B, T, D_in = x.shape
    D_hid = U.shape[0]
    f32 = jnp.float32
    cdt = jnp.dtype(compute_dtype)
    masked = mask is not None

    # ---- tile sizes --------------------------------------------------------
    n_bt = 2 if B >= 16 else 1          # batch tiles: exploit v7x's 2nd TC, gated on B
    BT = _round_up(_cdiv(B, n_bt), 8)   # sublane-dense batch tile
    Bp = n_bt * BT
    Dhp = _round_up(D_hid, 128)         # lane-dense hidden
    TT = int(time_block)                # timesteps per grid step
    Tp = _round_up(T, TT)
    n_tb = Tp // TT
    # Pad time at the FRONT for reverse so padded steps are processed AFTER all
    # real steps (they can never corrupt real outputs, even without a mask).
    off = (Tp - T) if reverse else 0

    # ---- hoisted, time-parallel input projection: xw[t] = x[:, t] @ W + b --
    xw = jnp.dot(x.reshape(B * T, D_in).astype(cdt), W.astype(cdt),
                 preferred_element_type=f32)                 # one big matmul, M=B*T
    xw = (xw + b.astype(f32)).reshape(B, T, D_hid)
    xw = jnp.transpose(xw, (1, 0, 2))                        # time-major (T, B, D_hid)
    xw_p = (jnp.zeros((Tp, Bp, Dhp), cdt)
            .at[off:off + T, :B, :D_hid].set(xw.astype(cdt)))

    Up = jnp.zeros((Dhp, Dhp), cdt).at[:D_hid, :D_hid].set(U.astype(cdt))
    if h0 is None:
        h0p = jnp.zeros((Bp, Dhp), f32)
    else:
        h0p = jnp.zeros((Bp, Dhp), f32).at[:B, :D_hid].set(h0.astype(f32))

    # ---- BlockSpecs --------------------------------------------------------
    t_blk = (lambda bi, ti: (n_tb - 1 - ti, bi, 0)) if reverse \
        else (lambda bi, ti: (ti, bi, 0))

    in_specs = [pl.BlockSpec((TT, BT, Dhp), t_blk)]                    # xw  (streamed)
    args = [xw_p]
    if masked:
        mp = (jnp.zeros((Tp, Bp, 1), f32)
              .at[off:off + T, :B, 0].set(jnp.transpose(mask, (1, 0)).astype(f32)))
        in_specs.append(pl.BlockSpec((Tp, BT, 1),
                                     lambda bi, ti: (0, bi, 0)))       # mask (resident)
        args.append(mp)
    in_specs += [
        pl.BlockSpec((Dhp, Dhp), lambda bi, ti: (0, 0)),               # U    (resident)
        pl.BlockSpec((BT, Dhp), lambda bi, ti: (bi, 0)),               # h0   (per tile)
    ]
    args += [Up, h0p]

    scratch = [pltpu.VMEM((BT, Dhp), f32)]              # h carry
    if masked:
        scratch.append(pltpu.VMEM((BT, Dhp), f32))      # y_tm1 carry

    # ---- VMEM budget (v5e scoped default ~16 MiB; v7x physical 64 MiB) -----
    csz = cdt.itemsize
    need = (2 * TT * BT * Dhp * (csz + 4)               # double-buffered xw in + y out
            + 2 * (Dhp * Dhp * csz + BT * Dhp * 4)      # U + h0 (allow 2x buffering)
            + (2 * Tp * BT * 4 if masked else 0)        # resident mask
            + (2 if masked else 1) * BT * Dhp * 4)      # scratch carries
    vmem_limit = int(min(max(2 * need, 32 * 1024 * 1024), 64 * 1024 * 1024))

    kernel = _make_rnn_kernel(TT, reverse, masked)

    y_tm = pl.pallas_call(
        kernel,
        out_shape=jax.ShapeDtypeStruct((Tp, Bp, Dhp), f32),
        grid_spec=pltpu.PrefetchScalarGridSpec(
            num_scalar_prefetch=0,
            grid=(n_bt, n_tb),                          # (batch tiles, time blocks)
            in_specs=in_specs,
            out_specs=pl.BlockSpec((TT, BT, Dhp), t_blk),
            scratch_shapes=scratch,
        ),
        compiler_params=pltpu.CompilerParams(
            # batch tiles independent (megacore); time MUST stay sequential.
            dimension_semantics=("parallel", "arbitrary"),
            vmem_limit_bytes=vmem_limit),
    )(*args)

    # drop padding, back to (B, T, D_hid)
    y = jnp.transpose(y_tm[off:off + T, :B, :D_hid], (1, 0, 2))
    return y.astype(x.dtype)


def rnn_layer_ref(x, W, U, b, mask=None, h0=None, reverse=False,
                  compute_dtype=jnp.bfloat16):
    """Pure-JAX reference (explicit Python time loop).  Mirrors the kernel's
    mixed-precision recipe (compute_dtype matmul inputs, f32 accumulation /
    tanh / blend) so the comparison isolates the Pallas implementation."""
    B, T, D_in = x.shape
    D_hid = U.shape[0]
    f32 = jnp.float32
    cdt = jnp.dtype(compute_dtype)

    xw = jnp.dot(x.reshape(B * T, D_in).astype(cdt), W.astype(cdt),
                 preferred_element_type=f32)
    xw = ((xw + b.astype(f32)).reshape(B, T, D_hid)).astype(cdt)
    Uc = U.astype(cdt)

    h = h0.astype(f32) if h0 is not None else jnp.zeros((B, D_hid), f32)
    y_prev = jnp.zeros((B, D_hid), f32)
    ys = [None] * T
    order = range(T - 1, -1, -1) if reverse else range(T)
    for t in order:
        pre = jnp.dot(h.astype(cdt), Uc,
                      preferred_element_type=f32) + xw[:, t].astype(f32)
        h_new = jnp.tanh(pre)
        if mask is not None:
            m = mask[:, t][:, None].astype(f32)
            h = h_new * m + h * (1.0 - m)
            y_t = h_new * m + y_prev * (1.0 - m)
        else:
            h = h_new
            y_t = h_new
        y_prev = y_t
        ys[t] = y_t
    return jnp.stack(ys, axis=1)


if __name__ == "__main__":
    key = jax.random.PRNGKey(0)
    k_x, k_m, k_w, k_u, k_b, k_h = jax.random.split(key, 6)

    def check(y, y_ref, shape):
        assert y.shape == shape, (y.shape, shape)
        err = float(jnp.max(jnp.abs(y - y_ref)))
        assert err < 5e-3, err

    # 1) aligned shapes, mask, forward, single time block
    B, T, Di, Dh = 8, 8, 128, 128
    x = jax.random.normal(k_x, (B, T, Di), dtype=jnp.float32)
    mask = (jax.random.uniform(k_m, (B, T)) > 0.3).astype(jnp.float32)
    W = 0.05 * jax.random.normal(k_w, (Di, Dh), dtype=jnp.float32)
    U = 0.05 * jax.random.normal(k_u, (Dh, Dh), dtype=jnp.float32)
    b = 0.01 * jax.random.normal(k_b, (Dh,), dtype=jnp.float32)
    y = rnn_layer_forward(x, W, U, b, mask=mask)
    jax.block_until_ready(y)
    check(y, rnn_layer_ref(x, W, U, b, mask=mask), (B, T, Dh))

    # 2) unaligned + reverse + init state + no mask + multiple time blocks
    B2, T2, Di2, Dh2 = 5, 19, 48, 96
    x2 = jax.random.normal(k_x, (B2, T2, Di2), dtype=jnp.float32)
    W2 = 0.05 * jax.random.normal(k_w, (Di2, Dh2), dtype=jnp.float32)
    U2 = 0.05 * jax.random.normal(k_u, (Dh2, Dh2), dtype=jnp.float32)
    b2 = 0.01 * jax.random.normal(k_b, (Dh2,), dtype=jnp.float32)
    h02 = 0.1 * jax.random.normal(k_h, (B2, Dh2), dtype=jnp.float32)
    y2 = rnn_layer_forward(x2, W2, U2, b2, mask=None, h0=h02, reverse=True)
    jax.block_until_ready(y2)
    check(y2, rnn_layer_ref(x2, W2, U2, b2, mask=None, h0=h02, reverse=True),
          (B2, T2, Dh2))

    # 3) masked + reverse + init state + multiple time blocks (unaligned)
    B3, T3, Di3, Dh3 = 4, 10, 32, 64
    x3 = jax.random.normal(k_x, (B3, T3, Di3), dtype=jnp.float32)
    m3 = (jax.random.uniform(k_m, (B3, T3)) > 0.4).astype(jnp.float32)
    W3 = 0.05 * jax.random.normal(k_w, (Di3, Dh3), dtype=jnp.float32)
    U3 = 0.05 * jax.random.normal(k_u, (Dh3, Dh3), dtype=jnp.float32)
    b3 = 0.01 * jax.random.normal(k_b, (Dh3,), dtype=jnp.float32)
    h03 = 0.1 * jax.random.normal(k_h, (B3, Dh3), dtype=jnp.float32)
    y3 = rnn_layer_forward(x3, W3, U3, b3, mask=m3, h0=h03, reverse=True)
    jax.block_until_ready(y3)
    check(y3, rnn_layer_ref(x3, W3, U3, b3, mask=m3, h0=h03, reverse=True),
          (B3, T3, Dh3))

    # 4) batch large enough for 2 batch tiles (parallel grid axis / megacore)
    B4, T4, Di4, Dh4 = 16, 5, 64, 128
    x4 = jax.random.normal(k_x, (B4, T4, Di4), dtype=jnp.float32)
    m4 = (jax.random.uniform(k_m, (B4, T4)) > 0.3).astype(jnp.float32)
    W4 = 0.05 * jax.random.normal(k_w, (Di4, Dh4), dtype=jnp.float32)
    U4 = 0.05 * jax.random.normal(k_u, (Dh4, Dh4), dtype=jnp.float32)
    b4 = 0.01 * jax.random.normal(k_b, (Dh4,), dtype=jnp.float32)
    y4 = rnn_layer_forward(x4, W4, U4, b4, mask=m4)
    jax.block_until_ready(y4)
    check(y4, rnn_layer_ref(x4, W4, U4, b4, mask=m4), (B4, T4, Dh4))

    print("KERNEL_OK")
</pallas_src>

<mosaic_0001>
module attributes {stable_mosaic.version = 11 : i64} {
  func.func @kernel(%arg0: i32, %arg1: i32, %arg2: memref<8x8x128xbf16, #tpu.memory_space<vmem>>, %arg3: memref<8x8x1xf32, #tpu.memory_space<vmem>>, %arg4: memref<128x128xbf16, #tpu.memory_space<vmem>>, %arg5: memref<8x128xf32, #tpu.memory_space<vmem>>, %arg6: memref<8x8x128xf32, #tpu.memory_space<vmem>>, %arg7: memref<8x128xf32, #tpu.memory_space<vmem>>, %arg8: memref<8x128xf32, #tpu.memory_space<vmem>>) attributes {dimension_semantics = [#tpu.dimension_semantics<parallel>, #tpu.dimension_semantics<arbitrary>], iteration_bounds = array<i64: 1, 1>, scalar_prefetch = 0 : i64, scratch_operands = 2 : i64, tpu.core_type = #tpu.core_type<tc>, window_params = [{transform_indices = @transform_0, window_bounds = array<i64: 8, 8, 128>}, {transform_indices = @transform_1, window_bounds = array<i64: 8, 8, 1>}, {pipeline_mode = #tpu.pipeline_mode<synchronous>, transform_indices = @transform_2, window_bounds = array<i64: 128, 128>}, {transform_indices = @transform_3, window_bounds = array<i64: 8, 128>}, {transform_indices = @transform_4, window_bounds = array<i64: 8, 8, 128>}]} {
    %c0_i32 = arith.constant 0 : i32
    %0 = arith.cmpi eq, %arg1, %c0_i32 : i32
    %1 = arith.extui %0 : i1 to i32
    %c0_i32_0 = arith.constant 0 : i32
    %2 = arith.cmpi ne, %1, %c0_i32_0 : i32
    scf.if %2 {
      %c0_75 = arith.constant 0 : index
      %c0_76 = arith.constant 0 : index
      %233 = vector.load %arg5[%c0_75, %c0_76] : memref<8x128xf32, #tpu.memory_space<vmem>>, vector<8x128xf32>
      %c0_77 = arith.constant 0 : index
      %c0_78 = arith.constant 0 : index
      %234 = vector.load %arg7[%c0_77, %c0_78] : memref<8x128xf32, #tpu.memory_space<vmem>>, vector<8x128xf32>
      tpu.vector_store %arg7[%c0_77, %c0_78], %233 {strides = array<i32>} : memref<8x128xf32, #tpu.memory_space<vmem>>, vector<8x128xf32>,
      %cst_79 = arith.constant 0.000000e+00 : f32
      %235 = vector.broadcast %cst_79 : f32 to vector<8x128xf32>
      %c0_80 = arith.constant 0 : index
      %c0_81 = arith.constant 0 : index
      %236 = vector.load %arg8[%c0_80, %c0_81] : memref<8x128xf32, #tpu.memory_space<vmem>>, vector<8x128xf32>
      tpu.vector_store %arg8[%c0_80, %c0_81], %235 {strides = array<i32>} : memref<8x128xf32, #tpu.memory_space<vmem>>, vector<8x128xf32>,
    } else {
    }
    %c8_i32 = arith.constant 8 : i32
    %3 = arith.muli %arg1, %c8_i32 : i32
    %c0 = arith.constant 0 : index
    %c0_1 = arith.constant 0 : index
    %4 = vector.load %arg4[%c0, %c0_1] : memref<128x128xbf16, #tpu.memory_space<vmem>>, vector<128x128xbf16>
    %c0_2 = arith.constant 0 : index
    %c0_3 = arith.constant 0 : index
    %5 = vector.load %arg7[%c0_2, %c0_3] : memref<8x128xf32, #tpu.memory_space<vmem>>, vector<8x128xf32>
    %c0_4 = arith.constant 0 : index
    %c0_5 = arith.constant 0 : index
    %6 = vector.load %arg8[%c0_4, %c0_5] : memref<8x128xf32, #tpu.memory_space<vmem>>, vector<8x128xf32>
    %c0_i32_6 = arith.constant 0 : i32
    %7 = arith.index_cast %c0_i32_6 : i32 to index
    %c0_7 = arith.constant 0 : index
    %c0_8 = arith.constant 0 : index
    %8 = vector.load %arg2[%7, %c0_7, %c0_8] : memref<8x8x128xbf16, #tpu.memory_space<vmem>>, vector<1x8x128xbf16>
    %9 = vector.shape_cast %8 : vector<1x8x128xbf16> to vector<8x128xbf16>
    %10 = arith.extf %9 : vector<8x128xbf16> to vector<8x128xf32>
    %11 = arith.addi %3, %c0_i32_6 : i32
    %12 = arith.index_cast %11 : i32 to index
    %c0_9 = arith.constant 0 : index
    %c0_10 = arith.constant 0 : index
    %13 = vector.load %arg3[%12, %c0_9, %c0_10] : memref<8x8x1xf32, #tpu.memory_space<vmem>>, vector<1x8x1xf32>
    %14 = vector.shape_cast %13 : vector<1x8x1xf32> to vector<8x1xf32>
    %15 = arith.truncf %5 : vector<8x128xf32> to vector<8x128xbf16>
    %cst = arith.constant dense<0.000000e+00> : vector<8x128xf32>
    %16 = tpu.matmul %15, %4, %cst {dimension_numbers = #tpu.dot_dimension_numbers<[1], [0], [0], [1], [0, 0, 1, 1], [], []>} : vector<8x128xbf16>, vector<128x128xbf16>, vector<8x128xf32> -> vector<8x128xf32>
    %17 = arith.addf %16, %10 : vector<8x128xf32>
    %18 = math.tanh %17 : vector<8x128xf32>
    %cst_11 = arith.constant 1.000000e+00 : f32
    %19 = vector.broadcast %cst_11 : f32 to vector<8x1xf32>
    %20 = arith.subf %19, %14 : vector<8x1xf32>
    %21 = vector.broadcast %14 : vector<8x1xf32> to vector<8x128xf32>
    %22 = arith.mulf %18, %21 : vector<8x128xf32>
    %23 = vector.broadcast %20 : vector<8x1xf32> to vector<8x128xf32>
    %24 = arith.mulf %5, %23 : vector<8x128xf32>
    %25 = arith.addf %22, %24 : vector<8x128xf32>
    %26 = vector.broadcast %14 : vector<8x1xf32> to vector<8x128xf32>
    %27 = arith.mulf %18, %26 : vector<8x128xf32>
    %28 = vector.broadcast %20 : vector<8x1xf32> to vector<8x128xf32>
    %29 = arith.mulf %6, %28 : vector<8x128xf32>
    %30 = arith.addf %27, %29 : vector<8x128xf32>
    %31 = arith.index_cast %c0_i32_6 : i32 to index
    %c0_12 = arith.constant 0 : index
    %c0_13 = arith.constant 0 : index
    %32 = vector.load %arg6[%31, %c0_12, %c0_13] : memref<8x8x128xf32, #tpu.memory_space<vmem>>, vector<1x8x128xf32>
    %33 = vector.shape_cast %32 : vector<1x8x128xf32> to vector<8x128xf32>
    %34 = vector.shape_cast %30 : vector<8x128xf32> to vector<1x8x128xf32>
    tpu.vector_store %arg6[%31, %c0_12, %c0_13], %34 {strides = array<i32>} : memref<8x8x128xf32, #tpu.memory_space<vmem>>, vector<1x8x128xf32>,
    %c1_i32 = arith.constant 1 : i32
    %35 = arith.index_cast %c1_i32 : i32 to index
    %c0_14 = arith.constant 0 : index
    %c0_15 = arith.constant 0 : index
    %36 = vector.load %arg2[%35, %c0_14, %c0_15] : memref<8x8x128xbf16, #tpu.memory_space<vmem>>, vector<1x8x128xbf16>
    %37 = vector.shape_cast %36 : vector<1x8x128xbf16> to vector<8x128xbf16>
    %38 = arith.extf %37 : vector<8x128xbf16> to vector<8x128xf32>
    %39 = arith.addi %3, %c1_i32 : i32
    %40 = arith.index_cast %39 : i32 to index
    %c0_16 = arith.constant 0 : index
    %c0_17 = arith.constant 0 : index
    %41 = vector.load %arg3[%40, %c0_16, %c0_17] : memref<8x8x1xf32, #tpu.memory_space<vmem>>, vector<1x8x1xf32>
    %42 = vector.shape_cast %41 : vector<1x8x1xf32> to vector<8x1xf32>
    %43 = arith.truncf %25 : vector<8x128xf32> to vector<8x128xbf16>
    %cst_18 = arith.constant dense<0.000000e+00> : vector<8x128xf32>
    %44 = tpu.matmul %43, %4, %cst_18 {dimension_numbers = #tpu.dot_dimension_numbers<[1], [0], [0], [1], [0, 0, 1, 1], [], []>} : vector<8x128xbf16>, vector<128x128xbf16>, vector<8x128xf32> -> vector<8x128xf32>
    %45 = arith.addf %44, %38 : vector<8x128xf32>
    %46 = math.tanh %45 : vector<8x128xf32>
    %cst_19 = arith.constant 1.000000e+00 : f32
    %47 = vector.broadcast %cst_19 : f32 to vector<8x1xf32>
    %48 = arith.subf %47, %42 : vector<8x1xf32>
    %49 = vector.broadcast %42 : vector<8x1xf32> to vector<8x128xf32>
    %50 = arith.mulf %46, %49 : vector<8x128xf32>
    %51 = vector.broadcast %48 : vector<8x1xf32> to vector<8x128xf32>
    %52 = arith.mulf %25, %51 : vector<8x128xf32>
    %53 = arith.addf %50, %52 : vector<8x128xf32>
    %54 = vector.broadcast %42 : vector<8x1xf32> to vector<8x128xf32>
    %55 = arith.mulf %46, %54 : vector<8x128xf32>
    %56 = vector.broadcast %48 : vector<8x1xf32> to vector<8x128xf32>
    %57 = arith.mulf %30, %56 : vector<8x128xf32>
    %58 = arith.addf %55, %57 : vector<8x128xf32>
    %59 = arith.index_cast %c1_i32 : i32 to index
    %c0_20 = arith.constant 0 : index
    %c0_21 = arith.constant 0 : index
    %60 = vector.load %arg6[%59, %c0_20, %c0_21] : memref<8x8x128xf32, #tpu.memory_space<vmem>>, vector<1x8x128xf32>
    %61 = vector.shape_cast %60 : vector<1x8x128xf32> to vector<8x128xf32>
    %62 = vector.shape_cast %58 : vector<8x128xf32> to vector<1x8x128xf32>
    tpu.vector_store %arg6[%59, %c0_20, %c0_21], %62 {strides = array<i32>} : memref<8x8x128xf32, #tpu.memory_space<vmem>>, vector<1x8x128xf32>,
    %c2_i32 = arith.constant 2 : i32
    %63 = arith.index_cast %c2_i32 : i32 to index
    %c0_22 = arith.constant 0 : index
    %c0_23 = arith.constant 0 : index
    %64 = vector.load %arg2[%63, %c0_22, %c0_23] : memref<8x8x128xbf16, #tpu.memory_space<vmem>>, vector<1x8x128xbf16>
    %65 = vector.shape_cast %64 : vector<1x8x128xbf16> to vector<8x128xbf16>
    %66 = arith.extf %65 : vector<8x128xbf16> to vector<8x128xf32>
    %67 = arith.addi %3, %c2_i32 : i32
    %68 = arith.index_cast %67 : i32 to index
    %c0_24 = arith.constant 0 : index
    %c0_25 = arith.constant 0 : index
    %69 = vector.load %arg3[%68, %c0_24, %c0_25] : memref<8x8x1xf32, #tpu.memory_space<vmem>>, vector<1x8x1xf32>
    %70 = vector.shape_cast %69 : vector<1x8x1xf32> to vector<8x1xf32>
    %71 = arith.truncf %53 : vector<8x128xf32> to vector<8x128xbf16>
    %cst_26 = arith.constant dense<0.000000e+00> : vector<8x128xf32>
    %72 = tpu.matmul %71, %4, %cst_26 {dimension_numbers = #tpu.dot_dimension_numbers<[1], [0], [0], [1], [0, 0, 1, 1], [], []>} : vector<8x128xbf16>, vector<128x128xbf16>, vector<8x128xf32> -> vector<8x128xf32>
    %73 = arith.addf %72, %66 : vector<8x128xf32>
    %74 = math.tanh %73 : vector<8x128xf32>
    %cst_27 = arith.constant 1.000000e+00 : f32
    %75 = vector.broadcast %cst_27 : f32 to vector<8x1xf32>
    %76 = arith.subf %75, %70 : vector<8x1xf32>
    %77 = vector.broadcast %70 : vector<8x1xf32> to vector<8x128xf32>
    %78 = arith.mulf %74, %77 : vector<8x128xf32>
    %79 = vector.broadcast %76 : vector<8x1xf32> to vector<8x128xf32>
    %80 = arith.mulf %53, %79 : vector<8x128xf32>
    %81 = arith.addf %78, %80 : vector<8x128xf32>
    %82 = vector.broadcast %70 : vector<8x1xf32> to vector<8x128xf32>
    %83 = arith.mulf %74, %82 : vector<8x128xf32>
    %84 = vector.broadcast %76 : vector<8x1xf32> to vector<8x128xf32>
    %85 = arith.mulf %58, %84 : vector<8x128xf32>
    %86 = arith.addf %83, %85 : vector<8x128xf32>
    %87 = arith.index_cast %c2_i32 : i32 to index
    %c0_28 = arith.constant 0 : index
    %c0_29 = arith.constant 0 : index
    %88 = vector.load %arg6[%87, %c0_28, %c0_29] : memref<8x8x128xf32, #tpu.memory_space<vmem>>, vector<1x8x128xf32>
    %89 = vector.shape_cast %88 : vector<1x8x128xf32> to vector<8x128xf32>
    %90 = vector.shape_cast %86 : vector<8x128xf32> to vector<1x8x128xf32>
    tpu.vector_store %arg6[%87, %c0_28, %c0_29], %90 {strides = array<i32>} : memref<8x8x128xf32, #tpu.memory_space<vmem>>, vector<1x8x128xf32>,
    %c3_i32 = arith.constant 3 : i32
    %91 = arith.index_cast %c3_i32 : i32 to index
    %c0_30 = arith.constant 0 : index
    %c0_31 = arith.constant 0 : index
    %92 = vector.load %arg2[%91, %c0_30, %c0_31] : memref<8x8x128xbf16, #tpu.memory_space<vmem>>, vector<1x8x128xbf16>
    %93 = vector.shape_cast %92 : vector<1x8x128xbf16> to vector<8x128xbf16>
    %94 = arith.extf %93 : vector<8x128xbf16> to vector<8x128xf32>
    %95 = arith.addi %3, %c3_i32 : i32
    %96 = arith.index_cast %95 : i32 to index
    %c0_32 = arith.constant 0 : index
    %c0_33 = arith.constant 0 : index
    %97 = vector.load %arg3[%96, %c0_32, %c0_33] : memref<8x8x1xf32, #tpu.memory_space<vmem>>, vector<1x8x1xf32>
    %98 = vector.shape_cast %97 : vector<1x8x1xf32> to vector<8x1xf32>
    %99 = arith.truncf %81 : vector<8x128xf32> to vector<8x128xbf16>
    %cst_34 = arith.constant dense<0.000000e+00> : vector<8x128xf32>
    %100 = tpu.matmul %99, %4, %cst_34 {dimension_numbers = #tpu.dot_dimension_numbers<[1], [0], [0], [1], [0, 0, 1, 1], [], []>} : vector<8x128xbf16>, vector<128x128xbf16>, vector<8x128xf32> -> vector<8x128xf32>
    %101 = arith.addf %100, %94 : vector<8x128xf32>
    %102 = math.tanh %101 : vector<8x128xf32>
    %cst_35 = arith.constant 1.000000e+00 : f32
    %103 = vector.broadcast %cst_35 : f32 to vector<8x1xf32>
    %104 = arith.subf %103, %98 : vector<8x1xf32>
    %105 = vector.broadcast %98 : vector<8x1xf32> to vector<8x128xf32>
    %106 = arith.mulf %102, %105 : vector<8x128xf32>
    %107 = vector.broadcast %104 : vector<8x1xf32> to vector<8x128xf32>
    %108 = arith.mulf %81, %107 : vector<8x128xf32>
    %109 = arith.addf %106, %108 : vector<8x128xf32>
    %110 = vector.broadcast %98 : vector<8x1xf32> to vector<8x128xf32>
    %111 = arith.mulf %102, %110 : vector<8x128xf32>
    %112 = vector.broadcast %104 : vector<8x1xf32> to vector<8x128xf32>
    %113 = arith.mulf %86, %112 : vector<8x128xf32>
    %114 = arith.addf %111, %113 : vector<8x128xf32>
    %115 = arith.index_cast %c3_i32 : i32 to index
    %c0_36 = arith.constant 0 : index
    %c0_37 = arith.constant 0 : index
    %116 = vector.load %arg6[%115, %c0_36, %c0_37] : memref<8x8x128xf32, #tpu.memory_space<vmem>>, vector<1x8x128xf32>
    %117 = vector.shape_cast %116 : vector<1x8x128xf32> to vector<8x128xf32>
    %118 = vector.shape_cast %114 : vector<8x128xf32> to vector<1x8x128xf32>
    tpu.vector_store %arg6[%115, %c0_36, %c0_37], %118 {strides = array<i32>} : memref<8x8x128xf32, #tpu.memory_space<vmem>>, vector<1x8x128xf32>,
    %c4_i32 = arith.constant 4 : i32
    %119 = arith.index_cast %c4_i32 : i32 to index
    %c0_38 = arith.constant 0 : index
    %c0_39 = arith.constant 0 : index
    %120 = vector.load %arg2[%119, %c0_38, %c0_39] : memref<8x8x128xbf16, #tpu.memory_space<vmem>>, vector<1x8x128xbf16>
    %121 = vector.shape_cast %120 : vector<1x8x128xbf16> to vector<8x128xbf16>
    %122 = arith.extf %121 : vector<8x128xbf16> to vector<8x128xf32>
    %123 = arith.addi %3, %c4_i32 : i32
    %124 = arith.index_cast %123 : i32 to index
    %c0_40 = arith.constant 0 : index
    %c0_41 = arith.constant 0 : index
    %125 = vector.load %arg3[%124, %c0_40, %c0_41] : memref<8x8x1xf32, #tpu.memory_space<vmem>>, vector<1x8x1xf32>
    %126 = vector.shape_cast %125 : vector<1x8x1xf32> to vector<8x1xf32>
    %127 = arith.truncf %109 : vector<8x128xf32> to vector<8x128xbf16>
    %cst_42 = arith.constant dense<0.000000e+00> : vector<8x128xf32>
    %128 = tpu.matmul %127, %4, %cst_42 {dimension_numbers = #tpu.dot_dimension_numbers<[1], [0], [0], [1], [0, 0, 1, 1], [], []>} : vector<8x128xbf16>, vector<128x128xbf16>, vector<8x128xf32> -> vector<8x128xf32>
    %129 = arith.addf %128, %122 : vector<8x128xf32>
    %130 = math.tanh %129 : vector<8x128xf32>
    %cst_43 = arith.constant 1.000000e+00 : f32
    %131 = vector.broadcast %cst_43 : f32 to vector<8x1xf32>
    %132 = arith.subf %131, %126 : vector<8x1xf32>
    %133 = vector.broadcast %126 : vector<8x1xf32> to vector<8x128xf32>
    %134 = arith.mulf %130, %133 : vector<8x128xf32>
    %135 = vector.broadcast %132 : vector<8x1xf32> to vector<8x128xf32>
    %136 = arith.mulf %109, %135 : vector<8x128xf32>
    %137 = arith.addf %134, %136 : vector<8x128xf32>
    %138 = vector.broadcast %126 : vector<8x1xf32> to vector<8x128xf32>
    %139 = arith.mulf %130, %138 : vector<8x128xf32>
    %140 = vector.broadcast %132 : vector<8x1xf32> to vector<8x128xf32>
    %141 = arith.mulf %114, %140 : vector<8x128xf32>
    %142 = arith.addf %139, %141 : vector<8x128xf32>
    %143 = arith.index_cast %c4_i32 : i32 to index
    %c0_44 = arith.constant 0 : index
    %c0_45 = arith.constant 0 : index
    %144 = vector.load %arg6[%143, %c0_44, %c0_45] : memref<8x8x128xf32, #tpu.memory_space<vmem>>, vector<1x8x128xf32>
    %145 = vector.shape_cast %144 : vector<1x8x128xf32> to vector<8x128xf32>
    %146 = vector.shape_cast %142 : vector<8x128xf32> to vector<1x8x128xf32>
    tpu.vector_store %arg6[%143, %c0_44, %c0_45], %146 {strides = array<i32>} : memref<8x8x128xf32, #tpu.memory_space<vmem>>, vector<1x8x128xf32>,
    %c5_i32 = arith.constant 5 : i32
    %147 = arith.index_cast %c5_i32 : i32 to index
    %c0_46 = arith.constant 0 : index
    %c0_47 = arith.constant 0 : index
    %148 = vector.load %arg2[%147, %c0_46, %c0_47] : memref<8x8x128xbf16, #tpu.memory_space<vmem>>, vector<1x8x128xbf16>
    %149 = vector.shape_cast %148 : vector<1x8x128xbf16> to vector<8x128xbf16>
    %150 = arith.extf %149 : vector<8x128xbf16> to vector<8x128xf32>
    %151 = arith.addi %3, %c5_i32 : i32
    %152 = arith.index_cast %151 : i32 to index
    %c0_48 = arith.constant 0 : index
    %c0_49 = arith.constant 0 : index
    %153 = vector.load %arg3[%152, %c0_48, %c0_49] : memref<8x8x1xf32, #tpu.memory_space<vmem>>, vector<1x8x1xf32>
    %154 = vector.shape_cast %153 : vector<1x8x1xf32> to vector<8x1xf32>
    %155 = arith.truncf %137 : vector<8x128xf32> to vector<8x128xbf16>
    %cst_50 = arith.constant dense<0.000000e+00> : vector<8x128xf32>
    %156 = tpu.matmul %155, %4, %cst_50 {dimension_numbers = #tpu.dot_dimension_numbers<[1], [0], [0], [1], [0, 0, 1, 1], [], []>} : vector<8x128xbf16>, vector<128x128xbf16>, vector<8x128xf32> -> vector<8x128xf32>
    %157 = arith.addf %156, %150 : vector<8x128xf32>
    %158 = math.tanh %157 : vector<8x128xf32>
    %cst_51 = arith.constant 1.000000e+00 : f32
    %159 = vector.broadcast %cst_51 : f32 to vector<8x1xf32>
    %160 = arith.subf %159, %154 : vector<8x1xf32>
    %161 = vector.broadcast %154 : vector<8x1xf32> to vector<8x128xf32>
    %162 = arith.mulf %158, %161 : vector<8x128xf32>
    %163 = vector.broadcast %160 : vector<8x1xf32> to vector<8x128xf32>
    %164 = arith.mulf %137, %163 : vector<8x128xf32>
    %165 = arith.addf %162, %164 : vector<8x128xf32>
    %166 = vector.broadcast %154 : vector<8x1xf32> to vector<8x128xf32>
    %167 = arith.mulf %158, %166 : vector<8x128xf32>
    %168 = vector.broadcast %160 : vector<8x1xf32> to vector<8x128xf32>
    %169 = arith.mulf %142, %168 : vector<8x128xf32>
    %170 = arith.addf %167, %169 : vector<8x128xf32>
    %171 = arith.index_cast %c5_i32 : i32 to index
    %c0_52 = arith.constant 0 : index
    %c0_53 = arith.constant 0 : index
    %172 = vector.load %arg6[%171, %c0_52, %c0_53] : memref<8x8x128xf32, #tpu.memory_space<vmem>>, vector<1x8x128xf32>
    %173 = vector.shape_cast %172 : vector<1x8x128xf32> to vector<8x128xf32>
    %174 = vector.shape_cast %170 : vector<8x128xf32> to vector<1x8x128xf32>
    tpu.vector_store %arg6[%171, %c0_52, %c0_53], %174 {strides = array<i32>} : memref<8x8x128xf32, #tpu.memory_space<vmem>>, vector<1x8x128xf32>,
    %c6_i32 = arith.constant 6 : i32
    %175 = arith.index_cast %c6_i32 : i32 to index
    %c0_54 = arith.constant 0 : index
    %c0_55 = arith.constant 0 : index
    %176 = vector.load %arg2[%175, %c0_54, %c0_55] : memref<8x8x128xbf16, #tpu.memory_space<vmem>>, vector<1x8x128xbf16>
    %177 = vector.shape_cast %176 : vector<1x8x128xbf16> to vector<8x128xbf16>
    %178 = arith.extf %177 : vector<8x128xbf16> to vector<8x128xf32>
    %179 = arith.addi %3, %c6_i32 : i32
    %180 = arith.index_cast %179 : i32 to index
    %c0_56 = arith.constant 0 : index
    %c0_57 = arith.constant 0 : index
    %181 = vector.load %arg3[%180, %c0_56, %c0_57] : memref<8x8x1xf32, #tpu.memory_space<vmem>>, vector<1x8x1xf32>
    %182 = vector.shape_cast %181 : vector<1x8x1xf32> to vector<8x1xf32>
    %183 = arith.truncf %165 : vector<8x128xf32> to vector<8x128xbf16>
    %cst_58 = arith.constant dense<0.000000e+00> : vector<8x128xf32>
    %184 = tpu.matmul %183, %4, %cst_58 {dimension_numbers = #tpu.dot_dimension_numbers<[1], [0], [0], [1], [0, 0, 1, 1], [], []>} : vector<8x128xbf16>, vector<128x128xbf16>, vector<8x128xf32> -> vector<8x128xf32>
    %185 = arith.addf %184, %178 : vector<8x128xf32>
    %186 = math.tanh %185 : vector<8x128xf32>
    %cst_59 = arith.constant 1.000000e+00 : f32
    %187 = vector.broadcast %cst_59 : f32 to vector<8x1xf32>
    %188 = arith.subf %187, %182 : vector<8x1xf32>
    %189 = vector.broadcast %182 : vector<8x1xf32> to vector<8x128xf32>
    %190 = arith.mulf %186, %189 : vector<8x128xf32>
    %191 = vector.broadcast %188 : vector<8x1xf32> to vector<8x128xf32>
    %192 = arith.mulf %165, %191 : vector<8x128xf32>
    %193 = arith.addf %190, %192 : vector<8x128xf32>
    %194 = vector.broadcast %182 : vector<8x1xf32> to vector<8x128xf32>
    %195 = arith.mulf %186, %194 : vector<8x128xf32>
    %196 = vector.broadcast %188 : vector<8x1xf32> to vector<8x128xf32>
    %197 = arith.mulf %170, %196 : vector<8x128xf32>
    %198 = arith.addf %195, %197 : vector<8x128xf32>
    %199 = arith.index_cast %c6_i32 : i32 to index
    %c0_60 = arith.constant 0 : index
    %c0_61 = arith.constant 0 : index
    %200 = vector.load %arg6[%199, %c0_60, %c0_61] : memref<8x8x128xf32, #tpu.memory_space<vmem>>, vector<1x8x128xf32>
    %201 = vector.shape_cast %200 : vector<1x8x128xf32> to vector<8x128xf32>
    %202 = vector.shape_cast %198 : vector<8x128xf32> to vector<1x8x128xf32>
    tpu.vector_store %arg6[%199, %c0_60, %c0_61], %202 {strides = array<i32>} : memref<8x8x128xf32, #tpu.memory_space<vmem>>, vector<1x8x128xf32>,
    %c7_i32 = arith.constant 7 : i32
    %203 = arith.index_cast %c7_i32 : i32 to index
    %c0_62 = arith.constant 0 : index
    %c0_63 = arith.constant 0 : index
    %204 = vector.load %arg2[%203, %c0_62, %c0_63] : memref<8x8x128xbf16, #tpu.memory_space<vmem>>, vector<1x8x128xbf16>
    %205 = vector.shape_cast %204 : vector<1x8x128xbf16> to vector<8x128xbf16>
    %206 = arith.extf %205 : vector<8x128xbf16> to vector<8x128xf32>
    %207 = arith.addi %3, %c7_i32 : i32
    %208 = arith.index_cast %207 : i32 to index
    %c0_64 = arith.constant 0 : index
    %c0_65 = arith.constant 0 : index
    %209 = vector.load %arg3[%208, %c0_64, %c0_65] : memref<8x8x1xf32, #tpu.memory_space<vmem>>, vector<1x8x1xf32>
    %210 = vector.shape_cast %209 : vector<1x8x1xf32> to vector<8x1xf32>
    %211 = arith.truncf %193 : vector<8x128xf32> to vector<8x128xbf16>
    %cst_66 = arith.constant dense<0.000000e+00> : vector<8x128xf32>
    %212 = tpu.matmul %211, %4, %cst_66 {dimension_numbers = #tpu.dot_dimension_numbers<[1], [0], [0], [1], [0, 0, 1, 1], [], []>} : vector<8x128xbf16>, vector<128x128xbf16>, vector<8x128xf32> -> vector<8x128xf32>
    %213 = arith.addf %212, %206 : vector<8x128xf32>
    %214 = math.tanh %213 : vector<8x128xf32>
    %cst_67 = arith.constant 1.000000e+00 : f32
    %215 = vector.broadcast %cst_67 : f32 to vector<8x1xf32>
    %216 = arith.subf %215, %210 : vector<8x1xf32>
    %217 = vector.broadcast %210 : vector<8x1xf32> to vector<8x128xf32>
    %218 = arith.mulf %214, %217 : vector<8x128xf32>
    %219 = vector.broadcast %216 : vector<8x1xf32> to vector<8x128xf32>
    %220 = arith.mulf %193, %219 : vector<8x128xf32>
    %221 = arith.addf %218, %220 : vector<8x128xf32>
    %222 = vector.broadcast %210 : vector<8x1xf32> to vector<8x128xf32>
    %223 = arith.mulf %214, %222 : vector<8x128xf32>
    %224 = vector.broadcast %216 : vector<8x1xf32> to vector<8x128xf32>
    %225 = arith.mulf %198, %224 : vector<8x128xf32>
    %226 = arith.addf %223, %225 : vector<8x128xf32>
    %227 = arith.index_cast %c7_i32 : i32 to index
    %c0_68 = arith.constant 0 : index
    %c0_69 = arith.constant 0 : index
    %228 = vector.load %arg6[%227, %c0_68, %c0_69] : memref<8x8x128xf32, #tpu.memory_space<vmem>>, vector<1x8x128xf32>
    %229 = vector.shape_cast %228 : vector<1x8x128xf32> to vector<8x128xf32>
    %230 = vector.shape_cast %226 : vector<8x128xf32> to vector<1x8x128xf32>
    tpu.vector_store %arg6[%227, %c0_68, %c0_69], %230 {strides = array<i32>} : memref<8x8x128xf32, #tpu.memory_space<vmem>>, vector<1x8x128xf32>,
    %c8_i32_70 = arith.constant 8 : i32
    %c0_71 = arith.constant 0 : index
    %c0_72 = arith.constant 0 : index
    %231 = vector.load %arg7[%c0_71, %c0_72] : memref<8x128xf32, #tpu.memory_space<vmem>>, vector<8x128xf32>
    tpu.vector_store %arg7[%c0_71, %c0_72], %221 {strides = array<i32>} : memref<8x128xf32, #tpu.memory_space<vmem>>, vector<8x128xf32>,
    %c0_73 = arith.constant 0 : index
    %c0_74 = arith.constant 0 : index
    %232 = vector.load %arg8[%c0_73, %c0_74] : memref<8x128xf32, #tpu.memory_space<vmem>>, vector<8x128xf32>
    tpu.vector_store %arg8[%c0_73, %c0_74], %226 {strides = array<i32>} : memref<8x128xf32, #tpu.memory_space<vmem>>, vector<8x128xf32>,
    return
  }
  func.func @transform_0(%arg0: i32, %arg1: i32) -> (i32, i32, i32) {
    %c0_i32 = arith.constant 0 : i32
    %c0_i32_0 = arith.constant 0 : i32
    return %arg1, %arg0, %c0_i32 : i32, i32, i32
  }
  func.func @transform_1(%arg0: i32, %arg1: i32) -> (i32, i32, i32) {
    %c0_i32 = arith.constant 0 : i32
    %c0_i32_0 = arith.constant 0 : i32
    %c0_i32_1 = arith.constant 0 : i32
    return %c0_i32, %arg0, %c0_i32_0 : i32, i32, i32
  }
  func.func @transform_2(%arg0: i32, %arg1: i32) -> (i32, i32) {
    %c0_i32 = arith.constant 0 : i32
    %c0_i32_0 = arith.constant 0 : i32
    %c0_i32_1 = arith.constant 0 : i32
    return %c0_i32, %c0_i32_0 : i32, i32
  }
  func.func @transform_3(%arg0: i32, %arg1: i32) -> (i32, i32) {
    %c0_i32 = arith.constant 0 : i32
    %c0_i32_0 = arith.constant 0 : i32
    return %arg0, %c0_i32 : i32, i32
  }
  func.func @transform_4(%arg0: i32, %arg1: i32) -> (i32, i32, i32) {
    %c0_i32 = arith.constant 0 : i32
    %c0_i32_0 = arith.constant 0 : i32
    return %arg1, %arg0, %c0_i32 : i32, i32, i32
  }
}

</mosaic_0001>

<bundles_post_ra>
// kernel: tpu_custom_call.1
= control target key start
LH: loop header
LB: loop body
LE: loop exit
PB: predicated region body
PF: predicated region fallthrough
CT: control target
= control target key end

     0   :  { %9 = vsyncpa [#allocation5], 0  ;;  %s1265_s0 = inlined_call_operand.hbm [shape: bf16[8,8,128], index: 0, kind: input, shape index: {}]   ;;  %s1266_s1 = inlined_call_operand.vmem [shape: f32[8,8,1], index: 1, kind: input, shape index: {}]   ;;  %s1267_s2 = inlined_call_operand.vmem [shape: bf16[128,128], index: 2, kind: input, shape index: {}]   ;;  %s1268_s3 = inlined_call_operand.vmem [shape: f32[8,128], index: 3, kind: input, shape index: {}]   ;;  %s1269_s4 = inlined_call_operand.hbm [shape: f32[8,8,128], index: 4, kind: output, shape index: {}]  }
   0x1   :  { %10 = vsyncpa [#allocation6], 0  ;;  %s996_s15 = smov [#allocation4]   ;;  %s948_s19 = scalar_lea.hbm %s1265_s0, 512 }
   0x2   :  { %s16_s16 = sshll.u32 %s996_s15, 4  ;;  %p949_p0 = scmp.ne.s32.totalorder %s1265_s0, %s948_s19  ;;  %s17_s16 = int_to_ptr.vmem [resolvable:$true] %s16_s16 }
   0x3   :  { %p952_p1 = scmp.lt.u32.totalorder %s948_s19, %s1265_s0 }
   0x5   :  { %p954_p2 = pnand %p952_p1, %p949_p0 }
   0x7   :  { %957 = shalt.err (!%p954_p2)
}
   0x8   :  { %s958_s24 = scalar_lea.vmem %s17_s16, 512  ;;  %p963_p4 = scmp.lt.s32.totalorder %s17_s16, %s17_s16 }
   0x9   :  { %p959_p3 = scmp.ne.s32.totalorder %s17_s16, %s958_s24  ;;  %p964_p5 = scmp.lt.s32.totalorder %s958_s24, %s958_s24 }
   0xb   :  { %p965_p6 = por %p964_p5, %p963_p4 }
   0xd   :  { %p966_p7 = pnand %p965_p6, %p959_p3 }
   0xf   :  { %969 = shalt.err (!%p966_p7)
}
  0x10   :  { %s997_s25 = smov 64   ;;  %s998_s26 = smov 4  }
  0x11   :  { %22 = dma.hbm_to_vmem [thread:$0]  %s1265_s0, 512, %s17_s16, [#allocation5], %s997_s25, %s997_s25, %s998_s26  }
  0x12   :  { %992 = dma.done.wait [#allocation5], 512  }
  0x13   :  { %993 = vsyncadd [#allocation5], 4294966784  ;;  %v999_v0 = vmov 0.0   ;;  %vm1000_vm0 = vmmov 0   ;;  %v1001_v1 = vmov 0   ;;  %v1051_v2 = vld [vmem:[%s1267_s2] sm:$0xff]  }
  0x14   :  { %753 = vmatprep.subr.bf16.mxu0 %v999_v0  ;;  %769 = vmatprep.mubr.msk.bf16.mxu0 %vm1000_vm0, %v999_v0  ;;  %v1057_v3 = vld [vmem:[%s1267_s2 + $0x8] sm:$0xff]   ;;  %v1066_v4 = vld [vmem:[%s1267_s2 + $0x10] sm:$0xff]   ;;  %v63_v5 = vld [vmem:[%s1266_s1] sm:$0xff] }
  0x15   :  { %922 = vset.pattern.permute.xlu0 %v1001_v1  ;;  %923 = vset.pattern.permute.xlu1 %v1001_v1  ;;  %v154_v6 = vsub.f32 1.0, %v63_v5  ;;  %v1078_v7 = vld [vmem:[%s1267_s2 + $0x18] sm:$0xff]   ;;  %v674_v8 = vld [vmem:[%s1266_s1 + $0x8] sm:$0xff]  ;;  %v1090_v10 = vld [vmem:[%s1267_s2 + $0x20] sm:$0xff]  }
  0x16   :  { %773 = vmatprep.subr.bf16.mxu1 %v999_v0  ;;  %789 = vmatprep.mubr.msk.bf16.mxu1 %vm1000_vm0, %v999_v0  ;;  %v220_v9 = vsub.f32 1.0, %v674_v8  ;;  %v675_v11 = vld [vmem:[%s1266_s1 + $0x10] sm:$0xff]  ;;  %v1102_v13 = vld [vmem:[%s1267_s2 + $0x28] sm:$0xff]   ;;  %v676_v14 = vld [vmem:[%s1266_s1 + $0x18] sm:$0xff] }
  0x17   :  { %754 = vmatpush3.bf16.msra.mxu0 %v1051_v2  ;;  %774 = vmatpush3.bf16.msra.mxu1 %v1051_v2  ;;  %v287_v12 = vsub.f32 1.0, %v675_v11  ;;  %v354_v15 = vsub.f32 1.0, %v676_v14  ;;  %v1114_v16 = vld [vmem:[%s1267_s2 + $0x30] sm:$0xff]   ;;  %v677_v17 = vld [vmem:[%s1266_s1 + $0x20] sm:$0xff]  ;;  %v1126_v19 = vld [vmem:[%s1267_s2 + $0x38] sm:$0xff]  }
  0x18   :  { %755 = vmatprep.subr.bf16.mxu0 %v999_v0  ;;  %775 = vmatprep.subr.bf16.mxu1 %v999_v0  ;;  %v421_v18 = vsub.f32 1.0, %v677_v17  ;;  %v37_v20 = vld [vmem:[%s1268_s3] sm:$0xff]  ;;  %v678_v21 = vld [vmem:[%s1266_s1 + $0x28] sm:$0xff]  ;;  %v679_v24 = vld [vmem:[%s1266_s1 + $0x30] sm:$0xff] }
  0x19   :  { %157 = vperm.xlu0 %922, %v63_v5   ;;  %223 = vperm.xlu1 %923, %v674_v8   ;;  %v488_v22 = vsub.f32 1.0, %v678_v21  ;;  %v64_v23 = vpack.c.bf16 %v37_v20, %v37_v20  ;;  %v555_v25 = vsub.f32 1.0, %v679_v24  ;;  %v680_v26 = vld [vmem:[%s1266_s1 + $0x38] sm:$0xff]  ;;  %v59_v28 = vld [vmem:[#allocation4] sm:$0xff]   ;;  %v239_v59 = vld [vmem:[#allocation4 + $0x8] sm:$0xff]   ;;  %s1002_s1 = smov [#allocation7]  }
  0x1a   :  { %v622_v27 = vsub.f32 1.0, %v680_v26  ;;  %v60_v29 = vunpack.c.l.bf16 %v59_v28  ;;  %v173_v44 = vunpack.c.h.bf16 %v59_v28  ;;  %v240_v60 = vunpack.c.l.bf16 %v239_v59  ;;  %s647_s7 = sshll.u32 %s1002_s1, 4  ;;  %s648_s7 = int_to_ptr.vmem [resolvable:$true] %s647_s7 }
  0x1b   :  { %756 = vmatpush3.bf16.msra.mxu0 %v1057_v3  ;;  %776 = vmatpush3.bf16.msra.mxu1 %v1057_v3  ;;  %s970_s8 = scalar_lea.vmem %s648_s7, 1024  ;;  %p975_p9 = scmp.lt.s32.totalorder %s648_s7, %s648_s7 }
  0x1c   :  { %757 = vmatprep.subr.bf16.mxu0 %v999_v0  ;;  %777 = vmatprep.subr.bf16.mxu1 %v999_v0  ;;  %p971_p8 = scmp.ne.s32.totalorder %s648_s7, %s970_s8  ;;  %p976_p10 = scmp.lt.s32.totalorder %s970_s8, %s970_s8 }
  0x1d   :  { %163 = vperm.xlu0 %922, %v154_v6   ;;  %229 = vperm.xlu1 %923, %v220_v9  }
  0x1e   :  { %p977_p11 = por %p976_p10, %p975_p9 }
  0x1f   :  { %758 = vmatpush3.bf16.msra.mxu0 %v1066_v4  ;;  %778 = vmatpush3.bf16.msra.mxu1 %v1066_v4 }
  0x20   :  { %759 = vmatprep.subr.bf16.mxu0 %v999_v0  ;;  %779 = vmatprep.subr.bf16.mxu1 %v999_v0  ;;  %p978_p12 = pnand %p977_p11, %p971_p8 }
  0x21   :  { %290 = vperm.xlu0 %922, %v675_v11   ;;  %296 = vperm.xlu1 %923, %v287_v12  }
  0x23   :  { %760 = vmatpush3.bf16.msra.mxu0 %v1078_v7  ;;  %780 = vmatpush3.bf16.msra.mxu1 %v1078_v7 }
  0x24   :  { %761 = vmatprep.subr.bf16.mxu0 %v999_v0  ;;  %781 = vmatprep.subr.bf16.mxu1 %v999_v0 }
  0x25   :  { %357 = vperm.xlu0 %922, %v676_v14   ;;  %363 = vperm.xlu1 %923, %v354_v15  }
  0x27   :  { %762 = vmatpush3.bf16.msra.mxu0 %v1090_v10  ;;  %782 = vmatpush3.bf16.msra.mxu1 %v1090_v10 }
  0x28   :  { %763 = vmatprep.subr.bf16.mxu0 %v999_v0  ;;  %783 = vmatprep.subr.bf16.mxu1 %v999_v0 }
  0x29   :  { %424 = vperm.xlu0 %922, %v677_v17   ;;  %430 = vperm.xlu1 %923, %v421_v18  }
  0x2b   :  { %764 = vmatpush3.bf16.msra.mxu0 %v1102_v13  ;;  %784 = vmatpush3.bf16.msra.mxu1 %v1102_v13 }
  0x2c   :  { %765 = vmatprep.subr.bf16.mxu0 %v999_v0  ;;  %785 = vmatprep.subr.bf16.mxu1 %v999_v0 }
  0x2d   :  { %491 = vperm.xlu0 %922, %v678_v21   ;;  %497 = vperm.xlu1 %923, %v488_v22  }
  0x2f   :  { %766 = vmatpush3.bf16.msra.mxu0 %v1114_v16  ;;  %786 = vmatpush3.bf16.msra.mxu1 %v1114_v16 }
  0x30   :  { %767 = vmatprep.subr.bf16.mxu0 %v999_v0  ;;  %787 = vmatprep.subr.bf16.mxu1 %v999_v0 }
  0x31   :  { %558 = vperm.xlu0 %922, %v679_v24   ;;  %564 = vperm.xlu1 %923, %v555_v25  }
  0x33   :  { %768 = vmatpush3.bf16.msra.mxu0 %v1126_v19  ;;  %788 = vmatpush3.bf16.msra.mxu1 %v1126_v19 }
  0x34   :  { %793 = vmatprep.subr.bf16.mxu0 %v999_v0  ;;  %813 = vmatprep.subr.bf16.mxu1 %v999_v0 }
  0x35   :  { %625 = vperm.xlu0 %922, %v680_v26   ;;  %631 = vperm.xlu1 %923, %v622_v27  }
  0x36   :  { %770 = vmatmul.mubr.bf16.vlgmr.msra.gmra.mrb[0].mxu0 %v64_v23 }
  0x37   :  { %794 = vmatpush3.bf16.msra.mxu0 %v1051_v2  ;;  %809 = vmatprep.mubr.msk.bf16.mxu0 %vm1000_vm0, %v999_v0 }
  0x38   :  { %795 = vmatprep.subr.bf16.mxu0 %v999_v0 }
  0x3b   :  { %796 = vmatpush3.bf16.msra.mxu0 %v1057_v3 }
  0x3c   :  { %797 = vmatprep.subr.bf16.mxu0 %v999_v0 }
  0x3f   :  { %798 = vmatpush3.bf16.msra.mxu0 %v1066_v4 }
  0x40   :  { %799 = vmatprep.subr.bf16.mxu0 %v999_v0 }
  0x43   :  { %800 = vmatpush3.bf16.msra.mxu0 %v1078_v7 }
  0x44   :  { %801 = vmatprep.subr.bf16.mxu0 %v999_v0 }
  0x47   :  { %802 = vmatpush3.bf16.msra.mxu0 %v1090_v10 }
  0x48   :  { %803 = vmatprep.subr.bf16.mxu0 %v999_v0 }
  0x4b   :  { %804 = vmatpush3.bf16.msra.mxu0 %v1102_v13 }
  0x4c   :  { %805 = vmatprep.subr.bf16.mxu0 %v999_v0 }
  0x4f   :  { %806 = vmatpush3.bf16.msra.mxu0 %v1114_v16 }
  0x50   :  { %807 = vmatprep.subr.bf16.mxu0 %v999_v0 }
  0x53   :  { %808 = vmatpush3.bf16.msra.mxu0 %v1126_v19 }
  0x54   :  { %833 = vmatprep.subr.bf16.mxu0 %v999_v0 }
  0x98   :  { %v158_v35 = vpop.permute.xlu0 %157  ;;  %v224_v50 = vpop.permute.xlu1 %223 }
  0x9c   :  { %v164_v37 = vpop.permute.xlu0 %163  ;;  %v230_v51 = vpop.permute.xlu1 %229 }
  0x9d   :  { %v166_v38 = vmul.f32 %v164_v37, %v37_v20  ;;  %v168_v39 = vmul.f32 0.0, %v164_v37  ;;  %v307_v20 = vunpack.c.h.bf16 %v239_v59 }
  0xa0   :  { %v291_v8 = vpop.permute.xlu0 %290  ;;  %v297_v9 = vpop.permute.xlu1 %296 }
  0xa4   :  { %v358_v27 = vpop.permute.xlu0 %357  ;;  %v364_v28 = vpop.permute.xlu1 %363 }
 0x109   :  { %v147_v30 = vpop.f32.mrb[0].mxu0 }
 0x10a   :  { %v148_v31 = vadd.f32 %v147_v30, %v60_v29  ;;  %v771_v32 = vpop.f32.mrb[1].mxu0 }
 0x10b   :  { %v150_v33 = vpop.f32.mrb[2].mxu0 }
 0x10c   :  { %932 = vtanh.f32 %v148_v31  ;;  %v772_v34 = vpop.f32.mrb[3].mxu0 }
 0x116   :  { %v933_v36 = vpop.eup %932 }
 0x117   :  { %v160_v40 = vmul.f32 %v933_v36, %v158_v35  ;;  %v373_v35 = vld [vmem:[#allocation4 + $0x10] sm:$0xff]  }
 0x118   :  { %v374_v36 = vunpack.c.l.bf16 %v373_v35 }
 0x119   :  { %v167_v41 = vadd.f32 %v166_v38, %v160_v40  ;;  %v169_v42 = vadd.f32 %v168_v39, %v160_v40 }
 0x11b   :  { %170 = vst [vmem:[#allocation7] sm:$0xff] %v169_v42  ;;  %v178_v43 = vpack.c.bf16 %v167_v41, %v167_v41  ;;  %v232_v53 = vmul.f32 %v230_v51, %v167_v41  ;;  %v234_v54 = vmul.f32 %v230_v51, %v169_v42 }
 0x11d   :  { %790 = vmatmul.mubr.bf16.vlgmr.msra.gmra.mrb[0].mxu1 %v178_v43  ;;  %v425_v43 = vpop.permute.xlu0 %424 }
 0x11e   :  { %814 = vmatpush3.bf16.msra.mxu1 %v1051_v2  ;;  %829 = vmatprep.mubr.msk.bf16.mxu1 %vm1000_vm0, %v999_v0 }
 0x11f   :  { %815 = vmatprep.subr.bf16.mxu1 %v999_v0 }
 0x122   :  { %816 = vmatpush3.bf16.msra.mxu1 %v1057_v3 }
 0x123   :  { %817 = vmatprep.subr.bf16.mxu1 %v999_v0 }
 0x126   :  { %818 = vmatpush3.bf16.msra.mxu1 %v1066_v4 }
 0x127   :  { %819 = vmatprep.subr.bf16.mxu1 %v999_v0 }
 0x12a   :  { %820 = vmatpush3.bf16.msra.mxu1 %v1078_v7 }
 0x12b   :  { %821 = vmatprep.subr.bf16.mxu1 %v999_v0 }
 0x12e   :  { %822 = vmatpush3.bf16.msra.mxu1 %v1090_v10 }
 0x12f   :  { %823 = vmatprep.subr.bf16.mxu1 %v999_v0 }
 0x132   :  { %824 = vmatpush3.bf16.msra.mxu1 %v1102_v13 }
 0x133   :  { %825 = vmatprep.subr.bf16.mxu1 %v999_v0 }
 0x136   :  { %826 = vmatpush3.bf16.msra.mxu1 %v1114_v16 }
 0x137   :  { %827 = vmatprep.subr.bf16.mxu1 %v999_v0 }
 0x13a   :  { %828 = vmatpush3.bf16.msra.mxu1 %v1126_v19 }
 0x13b   :  { %853 = vmatprep.subr.bf16.mxu1 %v999_v0 }
 0x1f0   :  { %v213_v45 = vpop.f32.mrb[0].mxu1 }
 0x1f1   :  { %v214_v46 = vadd.f32 %v213_v45, %v173_v44  ;;  %v791_v47 = vpop.f32.mrb[1].mxu1  ;;  %v431_v44 = vpop.permute.xlu1 %430 }
 0x1f2   :  { %v216_v48 = vpop.f32.mrb[2].mxu1 }
 0x1f3   :  { %934 = vtanh.f32 %v214_v46  ;;  %v792_v49 = vpop.f32.mrb[3].mxu1 }
 0x1fd   :  { %v935_v52 = vpop.eup %934 }
 0x1fe   :  { %v226_v55 = vmul.f32 %v935_v52, %v224_v50 }
 0x200   :  { %v233_v56 = vadd.f32 %v232_v53, %v226_v55  ;;  %v235_v57 = vadd.f32 %v234_v54, %v226_v55  ;;  %v492_v53 = vpop.permute.xlu0 %491  ;;  %v498_v54 = vpop.permute.xlu1 %497 }
 0x202   :  { %237 = vst [vmem:[#allocation7 + $0x8] sm:$0xff] %v235_v57  ;;  %v245_v58 = vpack.c.bf16 %v233_v56, %v233_v56  ;;  %v299_v12 = vmul.f32 %v297_v9, %v233_v56  ;;  %v301_v14 = vmul.f32 %v297_v9, %v235_v57 }
 0x204   :  { %810 = vmatmul.mubr.bf16.vlgmr.msra.gmra.mrb[4].mxu0 %v245_v58 }
 0x205   :  { %834 = vmatpush3.bf16.msra.mxu0 %v1051_v2  ;;  %849 = vmatprep.mubr.msk.bf16.mxu0 %vm1000_vm0, %v999_v0 }
 0x206   :  { %835 = vmatprep.subr.bf16.mxu0 %v999_v0 }
 0x209   :  { %836 = vmatpush3.bf16.msra.mxu0 %v1057_v3 }
 0x20a   :  { %837 = vmatprep.subr.bf16.mxu0 %v999_v0 }
 0x20d   :  { %838 = vmatpush3.bf16.msra.mxu0 %v1066_v4 }
 0x20e   :  { %839 = vmatprep.subr.bf16.mxu0 %v999_v0 }
 0x211   :  { %840 = vmatpush3.bf16.msra.mxu0 %v1078_v7 }
 0x212   :  { %841 = vmatprep.subr.bf16.mxu0 %v999_v0 }
 0x215   :  { %842 = vmatpush3.bf16.msra.mxu0 %v1090_v10 }
 0x216   :  { %843 = vmatprep.subr.bf16.mxu0 %v999_v0 }
 0x219   :  { %844 = vmatpush3.bf16.msra.mxu0 %v1102_v13 }
 0x21a   :  { %845 = vmatprep.subr.bf16.mxu0 %v999_v0 }
 0x21d   :  { %846 = vmatpush3.bf16.msra.mxu0 %v1114_v16 }
 0x21e   :  { %847 = vmatprep.subr.bf16.mxu0 %v999_v0 }
 0x221   :  { %848 = vmatpush3.bf16.msra.mxu0 %v1126_v19 }
 0x222   :  { %873 = vmatprep.subr.bf16.mxu0 %v999_v0 }
 0x2d7   :  { %v280_v61 = vpop.f32.mrb[4].mxu0 }
 0x2d8   :  { %v281_v62 = vadd.f32 %v280_v61, %v240_v60  ;;  %v811_v63 = vpop.f32.mrb[5].mxu0 }
 0x2d9   :  { %v283_v1 = vpop.f32.mrb[6].mxu0 }
 0x2da   :  { %936 = vtanh.f32 %v281_v62  ;;  %v812_v5 = vpop.f32.mrb[7].mxu0 }
 0x2db   :  { %v559_v5 = vpop.permute.xlu0 %558 }
 0x2e4   :  { %v937_v6 = vpop.eup %936 }
 0x2e5   :  { %v293_v11 = vmul.f32 %v937_v6, %v291_v8  ;;  %v565_v6 = vpop.permute.xlu1 %564 }
 0x2e7   :  { %v300_v15 = vadd.f32 %v299_v12, %v293_v11  ;;  %v302_v17 = vadd.f32 %v301_v14, %v293_v11 }
 0x2e9   :  { %304 = vst [vmem:[#allocation7 + $0x10] sm:$0xff] %v302_v17  ;;  %v312_v18 = vpack.c.bf16 %v300_v15, %v300_v15  ;;  %v366_v30 = vmul.f32 %v364_v28, %v300_v15  ;;  %v368_v31 = vmul.f32 %v364_v28, %v302_v17 }
 0x2eb   :  { %830 = vmatmul.mubr.bf16.vlgmr.msra.gmra.mrb[4].mxu1 %v312_v18 }
 0x2ec   :  { %854 = vmatpush3.bf16.msra.mxu1 %v1051_v2  ;;  %869 = vmatprep.mubr.msk.bf16.mxu1 %vm1000_vm0, %v999_v0 }
 0x2ed   :  { %855 = vmatprep.subr.bf16.mxu1 %v999_v0 }
 0x2f0   :  { %856 = vmatpush3.bf16.msra.mxu1 %v1057_v3 }
 0x2f1   :  { %857 = vmatprep.subr.bf16.mxu1 %v999_v0 }
 0x2f4   :  { %858 = vmatpush3.bf16.msra.mxu1 %v1066_v4 }
 0x2f5   :  { %859 = vmatprep.subr.bf16.mxu1 %v999_v0 }
 0x2f8   :  { %860 = vmatpush3.bf16.msra.mxu1 %v1078_v7 }
 0x2f9   :  { %861 = vmatprep.subr.bf16.mxu1 %v999_v0 }
 0x2fc   :  { %862 = vmatpush3.bf16.msra.mxu1 %v1090_v10 }
 0x2fd   :  { %863 = vmatprep.subr.bf16.mxu1 %v999_v0 }
 0x300   :  { %864 = vmatpush3.bf16.msra.mxu1 %v1102_v13 }
 0x301   :  { %865 = vmatprep.subr.bf16.mxu1 %v999_v0 }
 0x304   :  { %866 = vmatpush3.bf16.msra.mxu1 %v1114_v16 }
 0x305   :  { %867 = vmatprep.subr.bf16.mxu1 %v999_v0 }
 0x308   :  { %868 = vmatpush3.bf16.msra.mxu1 %v1126_v19 }
 0x309   :  { %893 = vmatprep.subr.bf16.mxu1 %v999_v0 }
 0x3be   :  { %v347_v21 = vpop.f32.mrb[4].mxu1 }
 0x3bf   :  { %v348_v22 = vadd.f32 %v347_v21, %v307_v20  ;;  %v831_v23 = vpop.f32.mrb[5].mxu1 }
 0x3c0   :  { %v350_v24 = vpop.f32.mrb[6].mxu1 }
 0x3c1   :  { %938 = vtanh.f32 %v348_v22  ;;  %v832_v25 = vpop.f32.mrb[7].mxu1 }
 0x3c2   :  { %v626_v25 = vpop.permute.xlu0 %625 }
 0x3cb   :  { %v939_v26 = vpop.eup %938 }
 0x3cc   :  { %v360_v29 = vmul.f32 %v939_v26, %v358_v27  ;;  %v632_v26 = vpop.permute.xlu1 %631 }
 0x3ce   :  { %v367_v32 = vadd.f32 %v366_v30, %v360_v29  ;;  %v369_v33 = vadd.f32 %v368_v31, %v360_v29 }
 0x3d0   :  { %371 = vst [vmem:[#allocation7 + $0x18] sm:$0xff] %v369_v33  ;;  %v379_v34 = vpack.c.bf16 %v367_v32, %v367_v32  ;;  %v433_v46 = vmul.f32 %v431_v44, %v367_v32  ;;  %v435_v47 = vmul.f32 %v431_v44, %v369_v33 }
 0x3d2   :  { %850 = vmatmul.mubr.bf16.vlgmr.msra.gmra.mrb[8].mxu0 %v379_v34 }
 0x3d3   :  { %874 = vmatpush3.bf16.msra.mxu0 %v1051_v2  ;;  %889 = vmatprep.mubr.msk.bf16.mxu0 %vm1000_vm0, %v999_v0 }
 0x3d4   :  { %875 = vmatprep.subr.bf16.mxu0 %v999_v0 }
 0x3d7   :  { %876 = vmatpush3.bf16.msra.mxu0 %v1057_v3 }
 0x3d8   :  { %877 = vmatprep.subr.bf16.mxu0 %v999_v0 }
 0x3db   :  { %878 = vmatpush3.bf16.msra.mxu0 %v1066_v4 }
 0x3dc   :  { %879 = vmatprep.subr.bf16.mxu0 %v999_v0 }
 0x3df   :  { %880 = vmatpush3.bf16.msra.mxu0 %v1078_v7 }
 0x3e0   :  { %881 = vmatprep.subr.bf16.mxu0 %v999_v0 }
 0x3e3   :  { %882 = vmatpush3.bf16.msra.mxu0 %v1090_v10 }
 0x3e4   :  { %883 = vmatprep.subr.bf16.mxu0 %v999_v0 }
 0x3e7   :  { %884 = vmatpush3.bf16.msra.mxu0 %v1102_v13 }
 0x3e8   :  { %885 = vmatprep.subr.bf16.mxu0 %v999_v0 }
 0x3eb   :  { %886 = vmatpush3.bf16.msra.mxu0 %v1114_v16 }
 0x3ec   :  { %887 = vmatprep.subr.bf16.mxu0 %v999_v0 }
 0x3ef   :  { %888 = vmatpush3.bf16.msra.mxu0 %v1126_v19 }
 0x4a5   :  { %v414_v37 = vpop.f32.mrb[8].mxu0 }
 0x4a6   :  { %v415_v38 = vadd.f32 %v414_v37, %v374_v36  ;;  %v851_v39 = vpop.f32.mrb[9].mxu0 }
 0x4a7   :  { %v417_v40 = vpop.f32.mrb[10].mxu0 }
 0x4a8   :  { %940 = vtanh.f32 %v415_v38  ;;  %v852_v41 = vpop.f32.mrb[11].mxu0 }
 0x4b2   :  { %v941_v42 = vpop.eup %940 }
 0x4b3   :  { %v427_v45 = vmul.f32 %v941_v42, %v425_v43 }
 0x4b5   :  { %v434_v48 = vadd.f32 %v433_v46, %v427_v45  ;;  %v436_v49 = vadd.f32 %v435_v47, %v427_v45 }
 0x4b7   :  { %438 = vst [vmem:[#allocation7 + $0x20] sm:$0xff] %v436_v49  ;;  %v446_v50 = vpack.c.bf16 %v434_v48, %v434_v48  ;;  %v502_v56 = vmul.f32 %v498_v54, %v436_v49 }
 0x4b9   :  { %870 = vmatmul.mubr.bf16.vlgmr.msra.gmra.mrb[8].mxu1 %v446_v50 }
 0x4ba   :  { %894 = vmatpush3.bf16.msra.mxu1 %v1051_v2  ;;  %909 = vmatprep.mubr.msk.bf16.mxu1 %vm1000_vm0, %v999_v0  ;;  %v441_v2 = vunpack.c.h.bf16 %v373_v35 }
 0x4bb   :  { %895 = vmatprep.subr.bf16.mxu1 %v999_v0 }
 0x4be   :  { %896 = vmatpush3.bf16.msra.mxu1 %v1057_v3 }
 0x4bf   :  { %897 = vmatprep.subr.bf16.mxu1 %v999_v0 }
 0x4c2   :  { %898 = vmatpush3.bf16.msra.mxu1 %v1066_v4 }
 0x4c3   :  { %899 = vmatprep.subr.bf16.mxu1 %v999_v0 }
 0x4c6   :  { %900 = vmatpush3.bf16.msra.mxu1 %v1078_v7 }
 0x4c7   :  { %901 = vmatprep.subr.bf16.mxu1 %v999_v0 }
 0x4ca   :  { %902 = vmatpush3.bf16.msra.mxu1 %v1090_v10 }
 0x4cb   :  { %903 = vmatprep.subr.bf16.mxu1 %v999_v0 }
 0x4ce   :  { %904 = vmatpush3.bf16.msra.mxu1 %v1102_v13  ;;  %v500_v13 = vmul.f32 %v498_v54, %v434_v48 }
 0x4cf   :  { %905 = vmatprep.subr.bf16.mxu1 %v999_v0 }
 0x4d2   :  { %906 = vmatpush3.bf16.msra.mxu1 %v1114_v16 }
 0x4d3   :  { %907 = vmatprep.subr.bf16.mxu1 %v999_v0  ;;  %v507_v0 = vld [vmem:[#allocation4 + $0x18] sm:$0xff]  }
 0x4d4   :  { %v575_v17 = vunpack.c.h.bf16 %v507_v0 }
 0x4d6   :  { %908 = vmatpush3.bf16.msra.mxu1 %v1126_v19  ;;  %v508_v19 = vunpack.c.l.bf16 %v507_v0 }
 0x58c   :  { %v481_v3 = vpop.f32.mrb[8].mxu1 }
 0x58d   :  { %v482_v4 = vadd.f32 %v481_v3, %v441_v2  ;;  %v871_v7 = vpop.f32.mrb[9].mxu1 }
 0x58e   :  { %v484_v51 = vpop.f32.mrb[10].mxu1 }
 0x58f   :  { %942 = vtanh.f32 %v482_v4  ;;  %v872_v52 = vpop.f32.mrb[11].mxu1 }
 0x599   :  { %v943_v10 = vpop.eup %942 }
 0x59a   :  { %v494_v55 = vmul.f32 %v943_v10, %v492_v53 }
 0x59c   :  { %v501_v57 = vadd.f32 %v500_v13, %v494_v55  ;;  %v503_v58 = vadd.f32 %v502_v56, %v494_v55 }
 0x59e   :  { %505 = vst [vmem:[#allocation7 + $0x28] sm:$0xff] %v503_v58  ;;  %v513_v16 = vpack.c.bf16 %v501_v57, %v501_v57  ;;  %v567_v9 = vmul.f32 %v565_v6, %v501_v57  ;;  %v569_v11 = vmul.f32 %v565_v6, %v503_v58 }
 0x5a0   :  { %890 = vmatmul.mubr.bf16.vlgmr.msra.gmra.mrb[12].mxu0 %v513_v16 }
 0x673   :  { %v548_v59 = vpop.f32.mrb[12].mxu0 }
 0x674   :  { %v549_v60 = vadd.f32 %v548_v59, %v508_v19  ;;  %v891_v61 = vpop.f32.mrb[13].mxu0 }
 0x675   :  { %v551_v62 = vpop.f32.mrb[14].mxu0 }
 0x676   :  { %944 = vtanh.f32 %v549_v60  ;;  %v892_v63 = vpop.f32.mrb[15].mxu0 }
 0x680   :  { %v945_v1 = vpop.eup %944 }
 0x681   :  { %v561_v8 = vmul.f32 %v945_v1, %v559_v5 }
 0x683   :  { %v568_v12 = vadd.f32 %v567_v9, %v561_v8  ;;  %v570_v14 = vadd.f32 %v569_v11, %v561_v8 }
 0x685   :  { %572 = vst [vmem:[#allocation7 + $0x30] sm:$0xff] %v570_v14  ;;  %v580_v15 = vpack.c.bf16 %v568_v12, %v568_v12  ;;  %v636_v27 = vmul.f32 %v632_v26, %v570_v14 }
 0x687   :  { %910 = vmatmul.mubr.bf16.vlgmr.msra.gmra.mrb[12].mxu1 %v580_v15 }
 0x75a   :  { %v615_v18 = vpop.f32.mrb[12].mxu1 }
 0x75b   :  { %v616_v20 = vadd.f32 %v615_v18, %v575_v17  ;;  %v911_v21 = vpop.f32.mrb[13].mxu1 }
 0x75c   :  { %v618_v22 = vpop.f32.mrb[14].mxu1 }
 0x75d   :  { %946 = vtanh.f32 %v616_v20  ;;  %v912_v23 = vpop.f32.mrb[15].mxu1 }
 0x767   :  { %v947_v24 = vpop.eup %946 }
 0x768   :  { %v628_v28 = vmul.f32 %v947_v24, %v626_v25 }
 0x76a   :  { %v637_v29 = vadd.f32 %v636_v27, %v628_v28 }
 0x76c   :  { %639 = vst [vmem:[#allocation7 + $0x38] sm:$0xff] %v637_v29 }
 0x76d   :  { %981 = shalt.err (!%p978_p12)
}
 0x76e   :  { %s982_s11 = scalar_lea.hbm %s1269_s4, 1024 }
 0x76f   :  { %p983_p13 = scmp.ne.s32.totalorder %s1269_s4, %s982_s11  ;;  %p986_p0 = scmp.lt.u32.totalorder %s982_s11, %s1269_s4 }
 0x771   :  { %p988_p1 = pnand %p986_p0, %p983_p13 }
 0x773   :  { %991 = shalt.err (!%p988_p1)
}
 0x774   :  { %s1003_s16 = smov 128   ;;  %s1004_s17 = smov 8  }
 0x775   :  { %653 = dma.vmem_to_hbm [thread:$0]  %s648_s7, 1024, %s1269_s4, [#allocation6], %s1003_s16, %s1003_s16, %s1004_s17  }
 0x776   :  { %994 = dma.done.wait [#allocation6], 1024  }
 0x777   :  { %995 = vsyncadd [#allocation6], 4294966272 }
 0x778   :  { %657 = vsyncpa [#allocation5], 1 }
 0x779   :  { %658 = vsyncpa [#allocation6], 1 }

</bundles_post_ra>
